<compile_context>
chip_gen: v5e
topology: v5e:2x2
jax: 0.10.0
libtpu: 0.0.40
codegen_flags: <defaults>
</compile_context>

<pallas_src>
import functools

import jax
import jax.numpy as jnp
from jax.experimental import pallas as pl
from jax.experimental.pallas import tpu as pltpu


def _round_up(x, m):
    return (x + m - 1) // m * m


def _pick_tile_hw(rows, hw, max_block_bytes):
    """Lane-tile width: multiple of 128 (>=128, <=2048), sized so an f32
    (rows, tile) block stays under max_block_bytes.  Falls back to the full
    row (always a legal block) when a single tile already covers it."""
    tile = (max_block_bytes // (4 * max(rows, 1))) // 128 * 128
    tile = max(tile, 128)
    tile = min(tile, 2048)
    if tile >= hw:
        return hw
    return tile


# ---------------------------------------------------------------------------
# Pass 1: per-row (n, c) sum and sum-of-squares over the H*W axis.
# ---------------------------------------------------------------------------
def _row_stats_kernel(x_ref, sum_ref, sumsq_ref, *, hw, thw):
    t = pl.program_id(0)

    @pl.when(t == 0)
    def _():
        sum_ref[...] = jnp.zeros_like(sum_ref)
        sumsq_ref[...] = jnp.zeros_like(sumsq_ref)

    x = x_ref[...].astype(jnp.float32)
    # Mask padding lanes of a (possibly) partial last tile.
    col = jax.lax.broadcasted_iota(jnp.int32, x.shape, 1) + t * thw
    x = jnp.where(col < hw, x, 0.0)

    sum_ref[...] += jnp.sum(x, axis=1, keepdims=True)
    sumsq_ref[...] += jnp.sum(x * x, axis=1, keepdims=True)


def _row_stats(x2, thw):
    R, HW = x2.shape
    kernel = functools.partial(_row_stats_kernel, hw=HW, thw=thw)
    return pl.pallas_call(
        kernel,
        out_shape=(jax.ShapeDtypeStruct((R, 1), jnp.float32),
                   jax.ShapeDtypeStruct((R, 1), jnp.float32)),
        grid_spec=pltpu.PrefetchScalarGridSpec(
            num_scalar_prefetch=0,
            grid=(pl.cdiv(HW, thw),),
            in_specs=[pl.BlockSpec((R, thw), lambda t: (0, t))],
            out_specs=(pl.BlockSpec((R, 1), lambda t: (0, 0)),
                       pl.BlockSpec((R, 1), lambda t: (0, 0))),
        ),
        compiler_params=pltpu.CompilerParams(
            dimension_semantics=("arbitrary",)),  # output-resident accumulator
    )(x2)


# ---------------------------------------------------------------------------
# Pass 2: tiled elementwise normalize + Gaussian reparameterized noise.
# All per-channel math is pre-folded into per-row (R, 1) coefficients:
#   normed  = x * s + t
#   out     = normed * gmu + bmu + noise * sqrt(normed^2 * va + vb)
# ---------------------------------------------------------------------------
def _apply_kernel(x_ref, noise_ref, s_ref, t_ref, gmu_ref, bmu_ref,
                  va_ref, vb_ref, out_ref):
    x = x_ref[...].astype(jnp.float32)
    noise = noise_ref[...].astype(jnp.float32)
    normed = x * s_ref[...] + t_ref[...]
    new_mean = normed * gmu_ref[...] + bmu_ref[...]
    new_var = normed * normed * va_ref[...] + vb_ref[...]
    out_ref[...] = (new_mean + noise * jnp.sqrt(new_var)).astype(out_ref.dtype)


@functools.partial(jax.jit,
                   static_argnames=("var_type", "eps", "max_block_bytes"))
def gaussian_batchnorm2d(x, gamma_mu, gamma_sigma, beta_mu, beta_sigma, noise,
                         *, var_type="sq", eps=1e-5, max_block_bytes=1 << 20):
    """x, noise: (N, C, H, W).  Gaussian params: (1, C, 1, 1)."""
    if var_type not in ("exp", "sq"):
        raise ValueError("The variance mode should be exp or sq.")

    N, C, H, W = x.shape
    HW = H * W
    R = N * C

    # Zero-cost views of NCHW: rows are (n, c) pairs.
    x2 = x.reshape(R, HW)
    noise2 = noise.reshape(R, HW)

    thw = _pick_tile_hw(R, HW, max_block_bytes)

    # ---- pass 1: one HBM read of x -> per-row partial stats ----------------
    row_sum, row_sumsq = _row_stats(x2, thw)

    # ---- tiny O(C) glue in plain JAX (hoisted out of the per-tile body) ----
    count = jnp.float32(N * HW)
    ch_sum = row_sum.reshape(N, C).sum(axis=0)
    ch_sumsq = row_sumsq.reshape(N, C).sum(axis=0)
    mean = ch_sum / count
    var = jnp.maximum(ch_sumsq / count - mean * mean, 0.0)   # biased variance
    inv_std = jax.lax.rsqrt(var + eps)

    gmu = gamma_mu.reshape(C).astype(jnp.float32)
    gsig = gamma_sigma.reshape(C).astype(jnp.float32)
    bmu = beta_mu.reshape(C).astype(jnp.float32)
    bsig = beta_sigma.reshape(C).astype(jnp.float32)
    if var_type == "sq":
        va, vb = jnp.square(gsig), jnp.square(bsig)
    else:
        va, vb = jnp.exp(gsig), jnp.exp(bsig)

    s = inv_std
    t = -mean * inv_std

    def per_row(p):  # (C,) -> (R, 1), repeated across the batch dimension
        return jnp.tile(p, (N,)).reshape(R, 1)

    params = [per_row(p) for p in (s, t, gmu, bmu, va, vb)]

    # ---- pass 2: lane-dense tiled elementwise kernel ------------------------
    out2 = pl.pallas_call(
        _apply_kernel,
        out_shape=jax.ShapeDtypeStruct((R, HW), x.dtype),
        grid_spec=pltpu.PrefetchScalarGridSpec(
            num_scalar_prefetch=0,
            grid=(pl.cdiv(HW, thw),),
            in_specs=[pl.BlockSpec((R, thw), lambda i: (0, i)),   # x
                      pl.BlockSpec((R, thw), lambda i: (0, i))]   # noise
                     + [pl.BlockSpec((R, 1), lambda i: (0, 0))] * 6,
            out_specs=pl.BlockSpec((R, thw), lambda i: (0, i)),
        ),
        compiler_params=pltpu.CompilerParams(
            dimension_semantics=("parallel",)),  # shard across v7x's 2 TCs
    )(x2, noise2, *params)

    return out2.reshape(N, C, H, W)


# ---------------------------------------------------------------------------
# Self-test
# ---------------------------------------------------------------------------
def _reference(x, gamma_mu, gamma_sigma, beta_mu, beta_sigma, noise,
               var_type, eps):
    mean = jnp.mean(x, axis=(0, 2, 3), keepdims=True)
    var = jnp.mean(jnp.square(x - mean), axis=(0, 2, 3), keepdims=True)
    normed = (x - mean) / jnp.sqrt(var + eps)
    new_mean = normed * gamma_mu + beta_mu
    if var_type == "sq":
        new_var = jnp.square(normed) * jnp.square(gamma_sigma) + jnp.square(beta_sigma)
    else:
        new_var = jnp.square(normed) * jnp.exp(gamma_sigma) + jnp.exp(beta_sigma)
    return new_mean + noise * jnp.sqrt(new_var)


if __name__ == "__main__":
    key = jax.random.PRNGKey(0)
    eps = 1e-5

    def make_inputs(key, N, C, H, W):
        k_x, k_gmu, k_gsig, k_bmu, k_bsig, k_eps = jax.random.split(key, 6)
        pshape = (1, C, 1, 1)
        # Parameter "init" matching the module's init_dict defaults.
        gamma_mu = 1.0 + 0.1 * jax.random.normal(k_gmu, pshape, jnp.float32)
        gamma_sigma = 1.0 * jax.random.normal(k_gsig, pshape, jnp.float32)
        beta_mu = 0.1 * jax.random.normal(k_bmu, pshape, jnp.float32)
        beta_sigma = 1.0 * jax.random.normal(k_bsig, pshape, jnp.float32)
        x = jax.random.normal(k_x, (N, C, H, W), jnp.float32)
        noise = jax.random.normal(k_eps, (N, C, H, W), jnp.float32)
        return x, gamma_mu, gamma_sigma, beta_mu, beta_sigma, noise

    # --- case 1: module-sized input, both variance modes --------------------
    N, C, H, W = 2, 4, 16, 16
    args = make_inputs(key, N, C, H, W)
    for vt in ("sq", "exp"):
        out = jax.block_until_ready(
            gaussian_batchnorm2d(*args, var_type=vt, eps=eps))
        ref = _reference(*args, var_type=vt, eps=eps)
        assert out.shape == (N, C, H, W) and out.dtype == jnp.float32
        assert jnp.allclose(out, ref, atol=1e-4, rtol=1e-4), f"mismatch ({vt})"

    # --- case 2: odd shapes + forced small tiles to exercise the tiled path
    #     (multiple lane tiles, masked partial last tile, non-multiple-of-8 rows)
    N2, C2, H2, W2 = 3, 5, 20, 20
    args2 = make_inputs(jax.random.PRNGKey(1), N2, C2, H2, W2)
    out2 = jax.block_until_ready(
        gaussian_batchnorm2d(*args2, var_type="sq", eps=eps,
                             max_block_bytes=8192))
    ref2 = _reference(*args2, var_type="sq", eps=eps)
    assert jnp.allclose(out2, ref2, atol=1e-4, rtol=1e-4), "mismatch (tiled)"

    print("KERNEL_OK")
</pallas_src>

<mosaic_0001>
module attributes {stable_mosaic.version = 11 : i64} {
  func.func @_row_stats_kernel(%arg0: i32, %arg1: memref<8x256xf32, #tpu.memory_space<vmem>>, %arg2: memref<8x1xf32, #tpu.memory_space<vmem>>, %arg3: memref<8x1xf32, #tpu.memory_space<vmem>>) attributes {dimension_semantics = [#tpu.dimension_semantics<arbitrary>], iteration_bounds = array<i64: 1>, scalar_prefetch = 0 : i64, scratch_operands = 0 : i64, tpu.core_type = #tpu.core_type<tc>, window_params = [{transform_indices = @transform_0, window_bounds = array<i64: 8, 256>}, {pipeline_mode = #tpu.pipeline_mode<synchronous>, transform_indices = @transform_1, window_bounds = array<i64: 8, 1>}, {pipeline_mode = #tpu.pipeline_mode<synchronous>, transform_indices = @transform_2, window_bounds = array<i64: 8, 1>}]} {
    %c0_i32 = arith.constant 0 : i32
    %0 = arith.cmpi eq, %arg0, %c0_i32 : i32
    %1 = arith.extui %0 : i1 to i32
    %c0_i32_0 = arith.constant 0 : i32
    %2 = arith.cmpi ne, %1, %c0_i32_0 : i32
    scf.if %2 {
      %cst_13 = arith.constant 0.000000e+00 : f32
      %23 = vector.broadcast %cst_13 : f32 to vector<8x1xf32>
      %c0_14 = arith.constant 0 : index
      %c0_15 = arith.constant 0 : index
      %24 = vector.load %arg2[%c0_14, %c0_15] : memref<8x1xf32, #tpu.memory_space<vmem>>, vector<8x1xf32>
      tpu.vector_store %arg2[%c0_14, %c0_15], %23 {strides = array<i32>} : memref<8x1xf32, #tpu.memory_space<vmem>>, vector<8x1xf32>,
      %cst_16 = arith.constant 0.000000e+00 : f32
      %25 = vector.broadcast %cst_16 : f32 to vector<8x1xf32>
      %c0_17 = arith.constant 0 : index
      %c0_18 = arith.constant 0 : index
      %26 = vector.load %arg3[%c0_17, %c0_18] : memref<8x1xf32, #tpu.memory_space<vmem>>, vector<8x1xf32>
      tpu.vector_store %arg3[%c0_17, %c0_18], %25 {strides = array<i32>} : memref<8x1xf32, #tpu.memory_space<vmem>>, vector<8x1xf32>,
    } else {
    }
    %c0 = arith.constant 0 : index
    %c0_1 = arith.constant 0 : index
    %3 = vector.load %arg1[%c0, %c0_1] : memref<8x256xf32, #tpu.memory_space<vmem>>, vector<8x256xf32>
    %4 = tpu.iota {dimensions = array<i32: 1>} : vector<8x256xi32>
    %c256_i32 = arith.constant 256 : i32
    %5 = arith.muli %arg0, %c256_i32 : i32
    %6 = vector.broadcast %5 : i32 to vector<8x256xi32>
    %7 = arith.addi %4, %6 : vector<8x256xi32>
    %c256_i32_2 = arith.constant 256 : i32
    %8 = vector.broadcast %c256_i32_2 : i32 to vector<8x256xi32>
    %9 = arith.cmpi slt, %7, %8 : vector<8x256xi32>
    %cst = arith.constant 0.000000e+00 : f32
    %10 = vector.broadcast %cst : f32 to vector<8x256xf32>
    %11 = arith.select %9, %3, %10 : vector<8x256xi1>, vector<8x256xf32>
    %c0_3 = arith.constant 0 : index
    %c0_4 = arith.constant 0 : index
    %12 = vector.load %arg2[%c0_3, %c0_4] : memref<8x1xf32, #tpu.memory_space<vmem>>, vector<8x1xf32>
    %cst_5 = arith.constant dense<0.000000e+00> : vector<8xf32>
    %13 = vector.multi_reduction <add>, %11, %cst_5 [1] : vector<8x256xf32> to vector<8xf32>
    %14 = vector.shape_cast %13 : vector<8xf32> to vector<8x1xf32>
    %15 = arith.addf %12, %14 : vector<8x1xf32>
    %c0_6 = arith.constant 0 : index
    %c0_7 = arith.constant 0 : index
    %16 = vector.load %arg2[%c0_6, %c0_7] : memref<8x1xf32, #tpu.memory_space<vmem>>, vector<8x1xf32>
    tpu.vector_store %arg2[%c0_6, %c0_7], %15 {strides = array<i32>} : memref<8x1xf32, #tpu.memory_space<vmem>>, vector<8x1xf32>,
    %c0_8 = arith.constant 0 : index
    %c0_9 = arith.constant 0 : index
    %17 = vector.load %arg3[%c0_8, %c0_9] : memref<8x1xf32, #tpu.memory_space<vmem>>, vector<8x1xf32>
    %18 = arith.mulf %11, %11 : vector<8x256xf32>
    %cst_10 = arith.constant dense<0.000000e+00> : vector<8xf32>
    %19 = vector.multi_reduction <add>, %18, %cst_10 [1] : vector<8x256xf32> to vector<8xf32>
    %20 = vector.shape_cast %19 : vector<8xf32> to vector<8x1xf32>
    %21 = arith.addf %17, %20 : vector<8x1xf32>
    %c0_11 = arith.constant 0 : index
    %c0_12 = arith.constant 0 : index
    %22 = vector.load %arg3[%c0_11, %c0_12] : memref<8x1xf32, #tpu.memory_space<vmem>>, vector<8x1xf32>
    tpu.vector_store %arg3[%c0_11, %c0_12], %21 {strides = array<i32>} : memref<8x1xf32, #tpu.memory_space<vmem>>, vector<8x1xf32>,
    return
  }
  func.func @transform_0(%arg0: i32) -> (i32, i32) {
    %c0_i32 = arith.constant 0 : i32
    %c0_i32_0 = arith.constant 0 : i32
    return %c0_i32, %arg0 : i32, i32
  }
  func.func @transform_1(%arg0: i32) -> (i32, i32) {
    %c0_i32 = arith.constant 0 : i32
    %c0_i32_0 = arith.constant 0 : i32
    %c0_i32_1 = arith.constant 0 : i32
    return %c0_i32, %c0_i32_0 : i32, i32
  }
  func.func @transform_2(%arg0: i32) -> (i32, i32) {
    %c0_i32 = arith.constant 0 : i32
    %c0_i32_0 = arith.constant 0 : i32
    %c0_i32_1 = arith.constant 0 : i32
    return %c0_i32, %c0_i32_0 : i32, i32
  }
}

module attributes {stable_mosaic.version = 11 : i64} {
  func.func @_apply_kernel(%arg0: i32, %arg1: memref<8x256xf32, #tpu.memory_space<vmem>>, %arg2: memref<8x256xf32, #tpu.memory_space<vmem>>, %arg3: memref<8x1xf32, #tpu.memory_space<vmem>>, %arg4: memref<8x1xf32, #tpu.memory_space<vmem>>, %arg5: memref<8x1xf32, #tpu.memory_space<vmem>>, %arg6: memref<8x1xf32, #tpu.memory_space<vmem>>, %arg7: memref<8x1xf32, #tpu.memory_space<vmem>>, %arg8: memref<8x1xf32, #tpu.memory_space<vmem>>, %arg9: memref<8x256xf32, #tpu.memory_space<vmem>>) attributes {dimension_semantics = [#tpu.dimension_semantics<parallel>], iteration_bounds = array<i64: 1>, scalar_prefetch = 0 : i64, scratch_operands = 0 : i64, tpu.core_type = #tpu.core_type<tc>, window_params = [{transform_indices = @transform_0, window_bounds = array<i64: 8, 256>}, {transform_indices = @transform_1, window_bounds = array<i64: 8, 256>}, {pipeline_mode = #tpu.pipeline_mode<synchronous>, transform_indices = @transform_2, window_bounds = array<i64: 8, 1>}, {pipeline_mode = #tpu.pipeline_mode<synchronous>, transform_indices = @transform_3, window_bounds = array<i64: 8, 1>}, {pipeline_mode = #tpu.pipeline_mode<synchronous>, transform_indices = @transform_4, window_bounds = array<i64: 8, 1>}, {pipeline_mode = #tpu.pipeline_mode<synchronous>, transform_indices = @transform_5, window_bounds = array<i64: 8, 1>}, {pipeline_mode = #tpu.pipeline_mode<synchronous>, transform_indices = @transform_6, window_bounds = array<i64: 8, 1>}, {pipeline_mode = #tpu.pipeline_mode<synchronous>, transform_indices = @transform_7, window_bounds = array<i64: 8, 1>}, {transform_indices = @transform_8, window_bounds = array<i64: 8, 256>}]} {
    %c0 = arith.constant 0 : index
    %c0_0 = arith.constant 0 : index
    %0 = vector.load %arg1[%c0, %c0_0] : memref<8x256xf32, #tpu.memory_space<vmem>>, vector<8x256xf32>
    %c0_1 = arith.constant 0 : index
    %c0_2 = arith.constant 0 : index
    %1 = vector.load %arg2[%c0_1, %c0_2] : memref<8x256xf32, #tpu.memory_space<vmem>>, vector<8x256xf32>
    %c0_3 = arith.constant 0 : index
    %c0_4 = arith.constant 0 : index
    %2 = vector.load %arg3[%c0_3, %c0_4] : memref<8x1xf32, #tpu.memory_space<vmem>>, vector<8x1xf32>
    %3 = vector.broadcast %2 : vector<8x1xf32> to vector<8x256xf32>
    %4 = arith.mulf %0, %3 : vector<8x256xf32>
    %c0_5 = arith.constant 0 : index
    %c0_6 = arith.constant 0 : index
    %5 = vector.load %arg4[%c0_5, %c0_6] : memref<8x1xf32, #tpu.memory_space<vmem>>, vector<8x1xf32>
    %6 = vector.broadcast %5 : vector<8x1xf32> to vector<8x256xf32>
    %7 = arith.addf %4, %6 : vector<8x256xf32>
    %c0_7 = arith.constant 0 : index
    %c0_8 = arith.constant 0 : index
    %8 = vector.load %arg5[%c0_7, %c0_8] : memref<8x1xf32, #tpu.memory_space<vmem>>, vector<8x1xf32>
    %9 = vector.broadcast %8 : vector<8x1xf32> to vector<8x256xf32>
    %10 = arith.mulf %7, %9 : vector<8x256xf32>
    %c0_9 = arith.constant 0 : index
    %c0_10 = arith.constant 0 : index
    %11 = vector.load %arg6[%c0_9, %c0_10] : memref<8x1xf32, #tpu.memory_space<vmem>>, vector<8x1xf32>
    %12 = vector.broadcast %11 : vector<8x1xf32> to vector<8x256xf32>
    %13 = arith.addf %10, %12 : vector<8x256xf32>
    %14 = arith.mulf %7, %7 : vector<8x256xf32>
    %c0_11 = arith.constant 0 : index
    %c0_12 = arith.constant 0 : index
    %15 = vector.load %arg7[%c0_11, %c0_12] : memref<8x1xf32, #tpu.memory_space<vmem>>, vector<8x1xf32>
    %16 = vector.broadcast %15 : vector<8x1xf32> to vector<8x256xf32>
    %17 = arith.mulf %14, %16 : vector<8x256xf32>
    %c0_13 = arith.constant 0 : index
    %c0_14 = arith.constant 0 : index
    %18 = vector.load %arg8[%c0_13, %c0_14] : memref<8x1xf32, #tpu.memory_space<vmem>>, vector<8x1xf32>
    %19 = vector.broadcast %18 : vector<8x1xf32> to vector<8x256xf32>
    %20 = arith.addf %17, %19 : vector<8x256xf32>
    %21 = math.sqrt %20 : vector<8x256xf32>
    %22 = arith.mulf %1, %21 : vector<8x256xf32>
    %23 = arith.addf %13, %22 : vector<8x256xf32>
    %c0_15 = arith.constant 0 : index
    %c0_16 = arith.constant 0 : index
    %24 = vector.load %arg9[%c0_15, %c0_16] : memref<8x256xf32, #tpu.memory_space<vmem>>, vector<8x256xf32>
    tpu.vector_store %arg9[%c0_15, %c0_16], %23 {strides = array<i32>} : memref<8x256xf32, #tpu.memory_space<vmem>>, vector<8x256xf32>,
    return
  }
  func.func @transform_0(%arg0: i32) -> (i32, i32) {
    %c0_i32 = arith.constant 0 : i32
    %c0_i32_0 = arith.constant 0 : i32
    return %c0_i32, %arg0 : i32, i32
  }
  func.func @transform_1(%arg0: i32) -> (i32, i32) {
    %c0_i32 = arith.constant 0 : i32
    %c0_i32_0 = arith.constant 0 : i32
    return %c0_i32, %arg0 : i32, i32
  }
  func.func @transform_2(%arg0: i32) -> (i32, i32) {
    %c0_i32 = arith.constant 0 : i32
    %c0_i32_0 = arith.constant 0 : i32
    %c0_i32_1 = arith.constant 0 : i32
    return %c0_i32, %c0_i32_0 : i32, i32
  }
  func.func @transform_3(%arg0: i32) -> (i32, i32) {
    %c0_i32 = arith.constant 0 : i32
    %c0_i32_0 = arith.constant 0 : i32
    %c0_i32_1 = arith.constant 0 : i32
    return %c0_i32, %c0_i32_0 : i32, i32
  }
  func.func @transform_4(%arg0: i32) -> (i32, i32) {
    %c0_i32 = arith.constant 0 : i32
    %c0_i32_0 = arith.constant 0 : i32
    %c0_i32_1 = arith.constant 0 : i32
    return %c0_i32, %c0_i32_0 : i32, i32
  }
  func.func @transform_5(%arg0: i32) -> (i32, i32) {
    %c0_i32 = arith.constant 0 : i32
    %c0_i32_0 = arith.constant 0 : i32
    %c0_i32_1 = arith.constant 0 : i32
    return %c0_i32, %c0_i32_0 : i32, i32
  }
  func.func @transform_6(%arg0: i32) -> (i32, i32) {
    %c0_i32 = arith.constant 0 : i32
    %c0_i32_0 = arith.constant 0 : i32
    %c0_i32_1 = arith.constant 0 : i32
    return %c0_i32, %c0_i32_0 : i32, i32
  }
  func.func @transform_7(%arg0: i32) -> (i32, i32) {
    %c0_i32 = arith.constant 0 : i32
    %c0_i32_0 = arith.constant 0 : i32
    %c0_i32_1 = arith.constant 0 : i32
    return %c0_i32, %c0_i32_0 : i32, i32
  }
  func.func @transform_8(%arg0: i32) -> (i32, i32) {
    %c0_i32 = arith.constant 0 : i32
    %c0_i32_0 = arith.constant 0 : i32
    return %c0_i32, %arg0 : i32, i32
  }
}

</mosaic_0001>

<bundles_post_ra>
// kernel: tile.3
= control target key start
LH: loop header
LB: loop body
LE: loop exit
PB: predicated region body
PF: predicated region fallthrough
CT: control target
= control target key end

     0   :  { %s34_s8 = smov 125   ;;  %s35_s9 = smov 126   ;;  %vm7_vm0 = vcmask 7168   ;;  %s61_s0 = inlined_call_operand.vmem [shape: f32[2,4], index: 0, kind: input, shape index: {}]   ;;  %s62_s1 = inlined_call_operand.vmem [shape: f32[8,1], index: 1, kind: output, shape index: {}]  }
   0x1   :  { %v4_v0 = vld [vmem:[%s61_s0] sm:$0x3]  ;;  %s33_s0 = smov 127  }
   0x2   :  { %5 = vst [vmem:[#allocation0] sm:$0x3] %v4_v0 }
   0x9   :  { %v9_v1 = vld [vmem:[#allocation0] sm:$0x3]  }
   0xa   :  { %v21_v2 = vld [vmem:[#allocation0] sm:$0x3]   ;;  %10 = vrot.lane.b32.xlu0 %v9_v1, %s33_s0 }
   0xb   :  { %22 = vrot.lane.b32.xlu1 %v21_v2, %s34_s8  ;;  %v15_v3 = vld [vmem:[#allocation0] sm:$0x3]  }
   0xc   :  { %v6_v4 = vld [vmem:[#allocation0] sm:$0x3]  }
   0xd   :  { %8 = vst.msk [vmem:[%s62_s1] ss:$4 sm:$0x3] %vm7_vm0, %v6_v4  }
  0x12   :  { %16 = vrot.lane.b32.xlu0 %v15_v3, %s35_s9 }
  0x7c   :  { %v11_v5 = vpop.permute.xlu0 %10  }
  0x7d   :  { %v23_v6 = vpop.permute.xlu1 %22   ;;  %27 = vst.msk [vmem:[%s62_s1 + $0x1] ss:$4 sm:$0x3] %vm7_vm0, %v11_v5  }
  0x7e   :  { %29 = vst.msk [vmem:[%s62_s1 + $0x3] ss:$4 sm:$0x3] %vm7_vm0, %v23_v6  }
  0x84   :  { %v17_v7 = vpop.permute.xlu0 %16  }
  0x85   :  { %28 = vst.msk [vmem:[%s62_s1 + $0x2] ss:$4 sm:$0x3] %vm7_vm0, %v17_v7  }

// kernel: tile.49
= control target key start
LH: loop header
LB: loop body
LE: loop exit
PB: predicated region body
PF: predicated region fallthrough
CT: control target
= control target key end

     0   :  { %s22_s0 = inlined_call_operand.vmem [shape: f32[4], index: 0, kind: input, shape index: {}]   ;;  %s23_s1 = inlined_call_operand.vmem [shape: f32[2,4], index: 1, kind: output, shape index: {}]  }
   0x1   :  { %v4_v0 = vld [vmem:[%s22_s0] ss:$0 sm:$0xff] }
   0x2   :  { %5 = vst [vmem:[%s23_s1] sm:$0x3] %v4_v0 }

// kernel: tile.40
= control target key start
LH: loop header
LB: loop body
LE: loop exit
PB: predicated region body
PF: predicated region fallthrough
CT: control target
= control target key end

     0   :  { %2 = vsyncpa [#allocation1], 0  ;;  %s48_s8 = smov [#allocation0]   ;;  %s65_s0 = inlined_call_operand.hbm [shape: f32[4], index: 0, kind: input, shape index: {}]   ;;  %s66_s1 = inlined_call_operand.vmem [shape: f32[2,4], index: 1, kind: output, shape index: {}]  }
   0x1   :  { %s8_s0 = sshll.u32 %s65_s0, 4  ;;  %s10_s9 = sshll.u32 %s48_s8, 4  ;;  %s9_s0 = int_to_ptr.hbm [resolvable:$true] %s8_s0  ;;  %s11_s9 = int_to_ptr.vmem [resolvable:$true] %s10_s9 }
   0x2   :  { %13 = dma.hbm_to_vmem [thread:$0]  %s9_s0, 16, %s11_s9, [#allocation1]  }
   0x3   :  { %46 = dma.done.wait [#allocation1], 16  }
   0x4   :  { %47 = vsyncadd [#allocation1], 4294967280  ;;  %v18_v0 = vld [vmem:[#allocation0] ss:$0 sm:$0xff] }
   0x5   :  { %19 = vst [vmem:[%s66_s1] sm:$0x3] %v18_v0 }
   0x6   :  { %20 = vsyncpa [#allocation1], 1 }

// kernel: gaussian_batchnorm2d.2
= control target key start
LH: loop header
LB: loop body
LE: loop exit
PB: predicated region body
PF: predicated region fallthrough
CT: control target
= control target key end

     0   :  { %vm14_vm0 = vcmask 7168   ;;  %v54_v2 = vmov 0.0   ;;  %s98_s0 = inlined_call_operand.vmem [shape: f32[8,256], index: 0, kind: input, shape index: {}]   ;;  %s99_s1 = inlined_call_operand.vmem [shape: f32[8,1], index: 1, kind: output, shape index: {0}]   ;;  %s100_s2 = inlined_call_operand.vmem [shape: f32[8,1], index: 2, kind: output, shape index: {1}]  }
   0x1   :  { %v17_v0 = vld [vmem:[%s98_s0] sm:$0xff]  ;;  %v18_v1 = vld [vmem:[%s98_s0 + $0x8] sm:$0xff]  ;;  %15 = vst.msk [vmem:[%s99_s1] sm:$0xff] %vm14_vm0, %v54_v2 }
   0x2   :  { %v31_v3 = vadd.f32 %v18_v1, %v17_v0  ;;  %16 = vst.msk [vmem:[%s100_s2] sm:$0xff] %vm14_vm0, %v54_v2  ;;  %v38_v4 = vmul.f32 %v17_v0, %v17_v0  ;;  %v39_v5 = vmul.f32 %v18_v1, %v18_v1 }
   0x4   :  { %32 = vadd.xlane.f32.xlu0 %v31_v3  ;;  %v40_v6 = vadd.f32 %v39_v5, %v38_v4 }
   0x8   :  { %v30_v7 = vld [vmem:[%s99_s1] sm:$0xff] }
   0x9   :  { %v37_v10 = vld [vmem:[%s100_s2] sm:$0xff] }
   0xc   :  { %41 = vadd.xlane.f32.xlu0 %v40_v6 }
  0x77   :  { %v33_v8 = vpop.xlane.xlu0 %32 }
  0x78   :  { %v34_v9 = vadd.f32 %v33_v8, %v30_v7 }
  0x7a   :  { %36 = vst.msk [vmem:[%s99_s1] sm:$0xff] %vm14_vm0, %v34_v9 }
  0x7f   :  { %v42_v11 = vpop.xlane.xlu0 %41 }
  0x80   :  { %v43_v12 = vadd.f32 %v42_v11, %v37_v10 }
  0x82   :  { %44 = vst.msk [vmem:[%s100_s2] sm:$0xff] %vm14_vm0, %v43_v12 }

// kernel: gaussian_batchnorm2d.3
= control target key start
LH: loop header
LB: loop body
LE: loop exit
PB: predicated region body
PF: predicated region fallthrough
CT: control target
= control target key end

     0   :  { %v125_v0 = vmov 0   ;;  %s207_s6 = inlined_call_operand.vmem [shape: f32[8,1], index: 6, kind: input, shape index: {}]   ;;  %s208_s2 = inlined_call_operand.vmem [shape: f32[8,1], index: 2, kind: input, shape index: {}]   ;;  %s209_s4 = inlined_call_operand.vmem [shape: f32[8,1], index: 4, kind: input, shape index: {}]   ;;  %s210_s7 = inlined_call_operand.vmem [shape: f32[8,1], index: 7, kind: input, shape index: {}]   ;;  %s211_s3 = inlined_call_operand.vmem [shape: f32[8,1], index: 3, kind: input, shape index: {}]   ;;  %s212_s5 = inlined_call_operand.vmem [shape: f32[8,1], index: 5, kind: input, shape index: {}]   ;;  %s213_s0 = inlined_call_operand.vmem [shape: f32[8,256], index: 0, kind: input, shape index: {}]   ;;  %s214_s1 = inlined_call_operand.vmem [shape: f32[8,256], index: 1, kind: input, shape index: {}]   ;;  %s215_s8 = inlined_call_operand.vmem [shape: f32[8,256], index: 8, kind: output, shape index: {}]  }
   0x1   :  { %119 = vset.pattern.permute.xlu1 %v125_v0  ;;  %118 = vset.pattern.permute.xlu0 %v125_v0  ;;  %v67_v1 = vld [vmem:[%s207_s6] sm:$0xff]  ;;  %v30_v10 = vld [vmem:[%s213_s0 + $0x8] sm:$0xff] }
   0x2   :  { %v33_v2 = vld [vmem:[%s208_s2] sm:$0xff]  ;;  %70 = vperm.xlu1 %119, %v67_v1   ;;  %120 = vset.pattern.permute.xlu2 %v125_v0  ;;  %v32_v43 = vld [vmem:[%s214_s1 + $0x8] sm:$0xff] }
   0x3   :  { %36 = vperm.xlu0 %118, %v33_v2   ;;  %v49_v3 = vld [vmem:[%s209_s4] sm:$0xff] }
   0x4   :  { %52 = vperm.xlu2 %120, %v49_v3   ;;  %v75_v4 = vld [vmem:[%s210_s7] sm:$0xff] }
   0x5   :  { %v41_v5 = vld [vmem:[%s211_s3] sm:$0xff] }
   0x6   :  { %v57_v6 = vld [vmem:[%s212_s5] sm:$0xff] }
   0x7   :  { %v29_v9 = vld [vmem:[%s213_s0] sm:$0xff] }
   0x8   :  { %v31_v39 = vld [vmem:[%s214_s1] sm:$0xff] }
   0xa   :  { %78 = vperm.xlu1 %119, %v75_v4  }
   0xb   :  { %44 = vperm.xlu0 %118, %v41_v5  }
   0xc   :  { %60 = vperm.xlu2 %120, %v57_v6  }
  0x5e   :  { %v53_v26 = vpop.permute.xlu2 %52 }
  0x66   :  { %v61_v38 = vpop.permute.xlu2 %60 }
  0x74   :  { %v71_v8 = vpop.permute.xlu1 %70 }
  0x75   :  { %v37_v7 = vpop.permute.xlu0 %36 }
  0x76   :  { %v39_v11 = vmul.f32 %v37_v7, %v29_v9  ;;  %v40_v12 = vmul.f32 %v37_v7, %v30_v10 }
  0x7c   :  { %v79_v20 = vpop.permute.xlu1 %78 }
  0x7d   :  { %v45_v13 = vpop.permute.xlu0 %44 }
  0x7e   :  { %v47_v14 = vadd.f32 %v45_v13, %v39_v11  ;;  %v48_v15 = vadd.f32 %v45_v13, %v40_v12 }
  0x80   :  { %v65_v16 = vmul.f32 %v47_v14, %v47_v14  ;;  %v66_v17 = vmul.f32 %v48_v15, %v48_v15  ;;  %v55_v36 = vmul.f32 %v53_v26, %v47_v14  ;;  %v56_v40 = vmul.f32 %v53_v26, %v48_v15 }
  0x82   :  { %v73_v18 = vmul.f32 %v71_v8, %v65_v16  ;;  %v74_v19 = vmul.f32 %v71_v8, %v66_v17  ;;  %v63_v48 = vadd.f32 %v61_v38, %v55_v36  ;;  %v64_v51 = vadd.f32 %v61_v38, %v56_v40 }
  0x84   :  { %v81_v21 = vadd.f32 %v79_v20, %v73_v18  ;;  %v82_v22 = vadd.f32 %v79_v20, %v74_v19 }
  0x86   :  { %121 = vrsqrt.f32 %v81_v21  ;;  %vm90_vm0 = vcmp.eq.f32.partialorder %v81_v21, inf  ;;  %v93_v41 = vand.u32 2147483648, %v81_v21  ;;  %vm92_vm1 = vcmp.eq.f32.partialorder %v81_v21, 0.0 }
  0x87   :  { %123 = vrsqrt.f32 %v82_v22  ;;  %vm102_vm2 = vcmp.eq.f32.partialorder %v82_v22, inf  ;;  %v105_v45 = vand.u32 2147483648, %v82_v22  ;;  %vm104_vm3 = vcmp.eq.f32.partialorder %v82_v22, 0.0 }
  0x8c   :  { %v122_v23 = vpop.eup %121 }
  0x8d   :  { %v124_v24 = vpop.eup %123  ;;  %v84_v25 = vmul.f32 %v122_v23, %v81_v21 }
  0x8e   :  { %v96_v27 = vmul.f32 %v124_v24, %v82_v22 }
  0x8f   :  { %v85_v28 = vmul.f32 %v122_v23, %v84_v25 }
  0x90   :  { %v97_v29 = vmul.f32 %v124_v24, %v96_v27 }
  0x91   :  { %v86_v30 = vmul.f32 0.5, %v85_v28 }
  0x92   :  { %v98_v31 = vmul.f32 0.5, %v97_v29 }
  0x93   :  { %v87_v32 = vsub.f32 1.5, %v86_v30 }
  0x94   :  { %v99_v33 = vsub.f32 1.5, %v98_v31 }
  0x95   :  { %v88_v34 = vmul.f32 %v122_v23, %v87_v32 }
  0x96   :  { %v100_v35 = vmul.f32 %v124_v24, %v99_v33 }
  0x97   :  { %v89_v37 = vmul.f32 %v88_v34, %v81_v21 }
  0x98   :  { %v101_v42 = vmul.f32 %v100_v35, %v82_v22 }
  0x99   :  { %v91_v44 = vsel %vm90_vm0, %v81_v21, %v89_v37 }
  0x9a   :  { %v94_v46 = vsel %vm92_vm1, %v93_v41, %v91_v44  ;;  %v103_v47 = vsel %vm102_vm2, %v82_v22, %v101_v42 }
  0x9b   :  { %v106_v49 = vsel %vm104_vm3, %v105_v45, %v103_v47  ;;  %v107_v50 = vmul.f32 %v94_v46, %v31_v39 }
  0x9c   :  { %v108_v52 = vmul.f32 %v106_v49, %v32_v43 }
  0x9d   :  { %v109_v53 = vadd.f32 %v107_v50, %v63_v48 }
  0x9e   :  { %v110_v54 = vadd.f32 %v108_v52, %v64_v51 }
  0x9f   :  { %111 = vst [vmem:[%s215_s8] sm:$0xff] %v109_v53 }
  0xa0   :  { %112 = vst [vmem:[%s215_s8 + $0x8] sm:$0xff] %v110_v54 }

</bundles_post_ra>
